<compile_context>
chip_gen: v7x
topology: tpu7x:2x2x1
jax: 0.10.0
libtpu: 0.0.40
codegen_flags: <defaults>
</compile_context>

<pallas_src>
import functools

import jax
import jax.numpy as jnp
from jax.experimental import pallas as pl
from jax.experimental.pallas import tpu as pltpu


def _sep_conv1x1_kernel(x_ref, w_ref, *o_refs):
    # x_ref : (C, T_s) if batch dim squeezed, else (n_b, C, T_s)
    # w_ref : (stack, C, C)  resident weight (constant index_map)
    # o_refs: stack refs, same leading layout as x_ref
    if len(x_ref.shape) == 2:            # n_b == 1, batch dim squeezed away
        x = x_ref[...]                                           # (C, T_s)
        for z, o_ref in enumerate(o_refs):
            o_ref[...] = jnp.dot(
                w_ref[z], x, preferred_element_type=jnp.float32
            ).astype(o_ref.dtype)
    else:                                 # batch-folded block (n_b, C, T_s)
        for b in range(x_ref.shape[0]):
            x = x_ref[b]                                         # (C, T_s)
            for z, o_ref in enumerate(o_refs):
                o_ref[b] = jnp.dot(
                    w_ref[z], x, preferred_element_type=jnp.float32
                ).astype(o_ref.dtype)


def _pick_tiling(N, HW, C, stack_size, dtype_bytes=4):
    """Choose (n_b, t_s, n_s, vmem_limit_bytes).

    n_b : batch rows folded into one block
    t_s : spatial tile (lanes)
    n_s : number of spatial tiles
    """
    # --- generation-aware VMEM budgets -----------------------------------
    try:
        info = pltpu.get_tpu_info()
        vmem_cap = int(getattr(info, "vmem_capacity_bytes", 64 * 1024 * 1024))
    except Exception:
        vmem_cap = 64 * 1024 * 1024                 # conservative (v7x-sized)
    if vmem_cap >= 96 * 1024 * 1024:                # v5e / v6e: 128 MiB VMEM
        vmem_limit = 64 * 1024 * 1024
        block_budget = 44 * 1024 * 1024
    else:                                           # v7x: 64 MiB VMEM per TC
        vmem_limit = 40 * 1024 * 1024
        block_budget = 14 * 1024 * 1024

    # --- full accounting: weight (double-buffered) + per-column traffic ---
    weight_bytes = 2 * stack_size * C * C * dtype_bytes
    # per spatial column (n_b = 1): double-buffered input + all stack outputs
    # + one f32 (C,) dot result held before the store.
    per_col = 2 * dtype_bytes * C * (1 + stack_size) + 4 * C
    cols_budget = max(128, (block_budget - weight_bytes) // per_col)

    # --- largest spatial tile that fits ------------------------------------
    if HW <= cols_budget:
        t_s, n_s = HW, 1
    else:
        t_s = max(128, (cols_budget // 128) * 128)
        n_s = pl.cdiv(HW, t_s)

    # --- fold batch rows for tiny feature maps (step-overhead dominated) ---
    n_b = 1
    if n_s == 1 and HW < 512:
        n_b = int(max(1, min(N, cols_budget // max(HW, 1))))

    # --- guarantee enough grid steps for pipelining & v7x core sharding ----
    target_steps = min(4, N * pl.cdiv(HW, 128))
    while n_b > 1 and pl.cdiv(N, n_b) * n_s < target_steps:
        n_b = max(1, n_b // 2)
    while pl.cdiv(N, n_b) * n_s < target_steps and t_s > 128:
        t_new = max(128, (((t_s + 1) // 2) + 127) // 128 * 128)
        if t_new >= t_s:
            break
        t_s = t_new
        n_s = pl.cdiv(HW, t_s)

    return n_b, t_s, n_s, vmem_limit


@functools.partial(jax.jit, static_argnames=("stack_size",))
def sep_conv1x1(x, w3d, stack_size):
    """1x1 conv (no bias) + fused channel split, NCHW-native.

    x:   [N, C, H, W]
    w3d: [stack_size, C, C]   (per-stack matmul-ready weights)
    returns tuple of stack_size arrays, each [N, C, H, W]
    """
    N, C, H, W = x.shape
    HW = H * W
    x3 = x.reshape(N, C, HW)                         # free, contiguous

    n_b, t_s, n_s, vmem_limit = _pick_tiling(
        N, HW, C, stack_size, dtype_bytes=x.dtype.itemsize)
    grid = (pl.cdiv(N, n_b), n_s)

    # Squeeze the batch dim out of the kernel refs when one row per block.
    lead = None if n_b == 1 else n_b
    data_block = (lead, C, t_s)

    outs = pl.pallas_call(
        _sep_conv1x1_kernel,
        out_shape=tuple(
            jax.ShapeDtypeStruct((N, C, HW), x.dtype) for _ in range(stack_size)
        ),
        grid_spec=pltpu.PrefetchScalarGridSpec(
            num_scalar_prefetch=0,
            grid=grid,
            in_specs=[
                pl.BlockSpec(data_block, lambda n, s: (n, 0, s)),
                # Constant index_map -> weight DMA'd once, stays resident.
                pl.BlockSpec((stack_size, C, C), lambda n, s: (0, 0, 0)),
            ],
            out_specs=[
                pl.BlockSpec(data_block, lambda n, s: (n, 0, s))
                for _ in range(stack_size)
            ],
        ),
        compiler_params=pltpu.CompilerParams(
            dimension_semantics=("parallel", "parallel"),
            vmem_limit_bytes=vmem_limit,
        ),
    )(x3, w3d)

    return tuple(o.reshape(N, C, H, W) for o in outs)


class ConvSeparatorPallas:
    """JAX/Pallas reimplementation of detectron2 ConvSeparator.forward."""

    def __init__(self, stack_size, feature_channels, key):
        self._stack_size = stack_size
        self.feature_channels = dict(feature_channels)
        self.in_features = list(feature_channels.keys())
        self._out_features = self.in_features
        # Synthetic deterministic weights matching nn.Conv2d shapes
        # [C*stack, C, 1, 1], bias=False; also stored matmul-ready as
        # (stack, C, C) so each stack chunk is a clean sublane-aligned slice.
        self.weights = {}
        self.weights3d = {}
        for f in self.in_features:
            key, sub = jax.random.split(key)
            c = self.feature_channels[f]
            w = jax.random.normal(
                sub, (c * stack_size, c, 1, 1), dtype=jnp.float32
            ) * (1.0 / jnp.sqrt(c))
            self.weights[f] = w
            self.weights3d[f] = w[:, :, 0, 0].reshape(stack_size, c, c)

    def __call__(self, features):
        per_feature = {
            f: sep_conv1x1(features[f], self.weights3d[f],
                           stack_size=self._stack_size)
            for f in self.in_features
        }
        return [
            {f: per_feature[f][z] for f in self._out_features}
            for z in range(self._stack_size)
        ]


if __name__ == "__main__":
    key = jax.random.PRNGKey(0)
    stack_size = 2
    feature_channels = {"p2": 4, "p3": 8}

    k1, k2, k3, k4, k5 = jax.random.split(key, 5)
    features = {
        "p2": jax.random.normal(k1, (2, 4, 16, 16), dtype=jnp.float32),
        "p3": jax.random.normal(k2, (2, 8, 8, 8), dtype=jnp.float32),
    }

    sep = ConvSeparatorPallas(stack_size, feature_channels, k3)
    out = sep(features)

    ok = True
    # Check module outputs against a plain-JAX reference.
    for z in range(stack_size):
        for f in sep.in_features:
            y = jax.block_until_ready(out[z][f])
            x = features[f]
            w2d = sep.weights[f][:, :, 0, 0]                  # [C*S, C]
            ref_full = jnp.einsum("nchw,oc->nohw", x, w2d)
            C = feature_channels[f]
            ref = ref_full[:, z * C:(z + 1) * C, :, :]
            if y.shape != x.shape:
                ok = False
            if not jnp.allclose(y, ref, atol=1e-4, rtol=1e-4):
                ok = False

    # Extra check: exercise the batch-folded (n_b > 1) kernel path with a
    # tiny-spatial, larger-batch input.
    xb = jax.random.normal(k4, (8, 8, 4, 4), dtype=jnp.float32)
    wb = jax.random.normal(k5, (8 * stack_size, 8), dtype=jnp.float32) / jnp.sqrt(8.0)
    outs_b = sep_conv1x1(xb, wb.reshape(stack_size, 8, 8), stack_size=stack_size)
    ref_b = jnp.einsum("nchw,oc->nohw", xb, wb)
    for z in range(stack_size):
        yb = jax.block_until_ready(outs_b[z])
        if not jnp.allclose(yb, ref_b[:, z * 8:(z + 1) * 8], atol=1e-4, rtol=1e-4):
            ok = False

    if ok:
        print("KERNEL_OK")
</pallas_src>

<mosaic_0001>
module attributes {stable_mosaic.version = 11 : i64} {
  func.func @_sep_conv1x1_kernel(%arg0: i32, %arg1: i32, %arg2: memref<1x4x128xf32, #tpu.memory_space<vmem>>, %arg3: memref<2x4x4xf32, #tpu.memory_space<vmem>>, %arg4: memref<1x4x128xf32, #tpu.memory_space<vmem>>, %arg5: memref<1x4x128xf32, #tpu.memory_space<vmem>>) attributes {dimension_semantics = [#tpu.dimension_semantics<parallel>, #tpu.dimension_semantics<parallel>], iteration_bounds = array<i64: 2, 2>, scalar_prefetch = 0 : i64, scratch_operands = 0 : i64, tpu.core_type = #tpu.core_type<tc>, window_params = [{transform_indices = @transform_0, window_bounds = array<i64: 1, 4, 128>}, {pipeline_mode = #tpu.pipeline_mode<synchronous>, transform_indices = @transform_1, window_bounds = array<i64: 2, 4, 4>}, {transform_indices = @transform_2, window_bounds = array<i64: 1, 4, 128>}, {transform_indices = @transform_3, window_bounds = array<i64: 1, 4, 128>}]} {
    %c0 = arith.constant 0 : index
    %c0_0 = arith.constant 0 : index
    %c0_1 = arith.constant 0 : index
    %0 = vector.load %arg2[%c0, %c0_0, %c0_1] : memref<1x4x128xf32, #tpu.memory_space<vmem>>, vector<1x4x128xf32>
    %1 = vector.shape_cast %0 : vector<1x4x128xf32> to vector<4x128xf32>
    %c0_2 = arith.constant 0 : index
    %c0_3 = arith.constant 0 : index
    %c0_4 = arith.constant 0 : index
    %2 = vector.load %arg3[%c0_2, %c0_3, %c0_4] : memref<2x4x4xf32, #tpu.memory_space<vmem>>, vector<1x4x4xf32>
    %3 = vector.shape_cast %2 : vector<1x4x4xf32> to vector<4x4xf32>
    %cst = arith.constant dense<0.000000e+00> : vector<4x128xf32>
    %4 = tpu.matmul %3, %1, %cst {dimension_numbers = #tpu.dot_dimension_numbers<[1], [0], [0], [1], [0, 0, 1, 1], [], []>} : vector<4x4xf32>, vector<4x128xf32>, vector<4x128xf32> -> vector<4x128xf32>
    %c0_5 = arith.constant 0 : index
    %c0_6 = arith.constant 0 : index
    %c0_7 = arith.constant 0 : index
    %5 = vector.load %arg4[%c0_5, %c0_6, %c0_7] : memref<1x4x128xf32, #tpu.memory_space<vmem>>, vector<1x4x128xf32>
    %6 = vector.shape_cast %5 : vector<1x4x128xf32> to vector<4x128xf32>
    %7 = vector.shape_cast %4 : vector<4x128xf32> to vector<1x4x128xf32>
    tpu.vector_store %arg4[%c0_5, %c0_6, %c0_7], %7 {strides = array<i32>} : memref<1x4x128xf32, #tpu.memory_space<vmem>>, vector<1x4x128xf32>,
    %c1 = arith.constant 1 : index
    %c0_8 = arith.constant 0 : index
    %c0_9 = arith.constant 0 : index
    %8 = vector.load %arg3[%c1, %c0_8, %c0_9] : memref<2x4x4xf32, #tpu.memory_space<vmem>>, vector<1x4x4xf32>
    %9 = vector.shape_cast %8 : vector<1x4x4xf32> to vector<4x4xf32>
    %cst_10 = arith.constant dense<0.000000e+00> : vector<4x128xf32>
    %10 = tpu.matmul %9, %1, %cst_10 {dimension_numbers = #tpu.dot_dimension_numbers<[1], [0], [0], [1], [0, 0, 1, 1], [], []>} : vector<4x4xf32>, vector<4x128xf32>, vector<4x128xf32> -> vector<4x128xf32>
    %c0_11 = arith.constant 0 : index
    %c0_12 = arith.constant 0 : index
    %c0_13 = arith.constant 0 : index
    %11 = vector.load %arg5[%c0_11, %c0_12, %c0_13] : memref<1x4x128xf32, #tpu.memory_space<vmem>>, vector<1x4x128xf32>
    %12 = vector.shape_cast %11 : vector<1x4x128xf32> to vector<4x128xf32>
    %13 = vector.shape_cast %10 : vector<4x128xf32> to vector<1x4x128xf32>
    tpu.vector_store %arg5[%c0_11, %c0_12, %c0_13], %13 {strides = array<i32>} : memref<1x4x128xf32, #tpu.memory_space<vmem>>, vector<1x4x128xf32>,
    return
  }
  func.func @transform_0(%arg0: i32, %arg1: i32) -> (i32, i32, i32) {
    %c0_i32 = arith.constant 0 : i32
    %c0_i32_0 = arith.constant 0 : i32
    return %arg0, %c0_i32, %arg1 : i32, i32, i32
  }
  func.func @transform_1(%arg0: i32, %arg1: i32) -> (i32, i32, i32) {
    %c0_i32 = arith.constant 0 : i32
    %c0_i32_0 = arith.constant 0 : i32
    %c0_i32_1 = arith.constant 0 : i32
    %c0_i32_2 = arith.constant 0 : i32
    return %c0_i32, %c0_i32_0, %c0_i32_1 : i32, i32, i32
  }
  func.func @transform_2(%arg0: i32, %arg1: i32) -> (i32, i32, i32) {
    %c0_i32 = arith.constant 0 : i32
    %c0_i32_0 = arith.constant 0 : i32
    return %arg0, %c0_i32, %arg1 : i32, i32, i32
  }
  func.func @transform_3(%arg0: i32, %arg1: i32) -> (i32, i32, i32) {
    %c0_i32 = arith.constant 0 : i32
    %c0_i32_0 = arith.constant 0 : i32
    return %arg0, %c0_i32, %arg1 : i32, i32, i32
  }
}

</mosaic_0001>

<bundles_post_ra>
// kernel: sep_conv1x1.1
= control target key start
LH: loop header
LB: loop body
LE: loop exit
PB: predicated region body
PF: predicated region fallthrough
CT: control target
= control target key end

     0   :  { %s649_s12 = smov 0   ;;  %s651_s13 = smov 0   ;;  %s709_s0 = inlined_call_operand.vmem [shape: f32[2,4,256], index: 0, kind: input, shape index: {}]   ;;  %s710_s1 = inlined_call_operand.vmem [shape: f32[2,4,4], index: 1, kind: input, shape index: {}]   ;;  %s711_s2 = inlined_call_operand.vmem [shape: f32[2,4,256], index: 2, kind: output, shape index: {0}]   ;;  %s712_s3 = inlined_call_operand.vmem [shape: f32[2,4,256], index: 3, kind: output, shape index: {1}]  }
   0x1   :  { %s653_s14 = smov 0   ;;  %s655_s15 = smov 0  }
   0x2   :  { %s657_s16 = smov 0  }
   0x3 LB: > { %s23_s17 = sadd.s32 1, %s617_s14  ;;  %s26_s18 = sadd.s32 1, %s621_s15  ;;  %s625_s16 = sphi %s657_s16, %s14_s16   ;;  %s621_s15 = sphi %s655_s15, %s716_s15   ;;  %s617_s14 = sphi %s653_s14, %s715_s14   ;;  %s613_s13 = sphi %s651_s13, %s714_s13   ;;  %s609_s12 = sphi %s649_s12, %s713_s12  }
   0x4   : > { %p24_p0 = scmp.ge.s32.totalorder %s23_s17, 2  ;;  %p517_p1 = scmp.ge.s32.totalorder %s625_s16, 1 }
   0x5   : > { %p161_p2 = scmp.lt.s32.totalorder %s625_s16, 5 }
   0x6   : > { %s718_s17 = smov (%p24_p0, %s23_s17), 0  ;;  %s720_s18 = smov (!%p24_p0, %s26_s18), %s621_s15 }
   0x7   : > { %p162_p3 = pnand %p517_p1, %p161_p2  ;;  %p28_p4 = scmp.ge.s32.totalorder %s720_s18, 2 }
   0x8   : > { %p199_p5 = scmp.lt.s32.totalorder (!%p162_p3), %s613_s13, 1  ;;  %p201_p6 = scmp.lt.s32.totalorder (!%p162_p3), %s609_s12, 1  ;;  %v627_v0 = vmov (!%p162_p3), 0.0   ;;  %vm628_vm0 = vmmov (!%p162_p3), 0   ;;  %vm229_vm1 = vcmask (!%p162_p3), 1043456   ;;  %vm225_vm2 = vcmask (!%p162_p3), 31744  }
   0x9   : > { %s722_s18 = smov (%p28_p4, %s720_s18), 0  ;;  %165 = sbr.rel (%p162_p3) target bundleno = 236 (0xec), region = 28 }
   0xa   : > { %535 = vmatprep.subr.mxu0 (!%p162_p3), %v627_v0  ;;  %540 = vmatprep.subr.mxu1 (!%p162_p3), %v627_v0  ;;  %v224_v1 = vld [vmem:[%s710_s1] sm:$0xf] (!%p162_p3)  ;;  %v526_v2 = vld [vmem:[%s710_s1 + $0x4] sm:$0xf] (!%p162_p3) }
   0xb   : > { %537 = vmatprep.mubr.msk.f32.mxu0 (!%p162_p3), %vm628_vm0, %v627_v0  ;;  %542 = vmatprep.mubr.msk.f32.mxu1 (!%p162_p3), %vm628_vm0, %v627_v0 }
  0x10   : > { %s724_s13 = smov (!%p199_p5, %s613_s13), 1  ;;  %s726_s12 = smov (!%p201_p6, %s609_s12), 1 }
  0x11   : > { %s518_s19 = sshll.u32 %s724_s13, 1 }
  0x12   : > { %s204_s20 = sadd.s32 %s518_s19, %s726_s12 }
  0x13   : > { %s519_s21 = sshll.u32 %s204_s20, 2 }
  0x14   : > { %s206_s24 = scalar_lea.vmem %s709_s0, %s519_s21  ;;  %s214_s4 = scalar_lea.vmem %s711_s2, %s519_s21 }
  0x15   : > { %v223_v3 = vld [vmem:[%s206_s24] sm:$0xf]  ;;  %s222_s7 = scalar_lea.vmem %s712_s3, %s519_s21 }
  0x16   : > { %536 = vmatpush3.msk.msra.mxu0 %vm229_vm1, %v223_v3  ;;  %541 = vmatpush3.msk.msra.mxu1 %vm229_vm1, %v223_v3 }
  0x17   : > { %538 = vmatmul.mubr.msk.f32.vlgmr.msra.gmra.mrb[0].mxu0 %vm225_vm2, %v224_v1  ;;  %543 = vmatmul.mubr.msk.f32.vlgmr.msra.gmra.mrb[0].mxu1 %vm225_vm2, %v526_v2 }
  0xea   : > { %v299_v4 = vpop.f32.mrb[0].mxu0  ;;  %v375_v5 = vpop.f32.mrb[0].mxu1 }
  0xeb   : > { %303 = vst [vmem:[%s214_s4] sm:$0xf] %v299_v4  ;;  %379 = vst [vmem:[%s222_s7] sm:$0xf] %v375_v5  ;;  %v539_v6 = vpop.f32.mrb[1].mxu0  ;;  %v544_v7 = vpop.f32.mrb[1].mxu1 }
  0xec PF: > { %s14_s16 = sadd.s32 1, %s625_s16   ;;  %s713_s12 = smov %s617_s14 }
  0xed   : > { %p11_p7 = scmp.ge.s32.totalorder %s14_s16, 6   ;;  %s714_s13 = smov %s621_s15 }
  0xee   : > { %s715_s14 = smov %s718_s17  ;;  %s716_s15 = smov %s722_s18 }
  0xef   :  { %13 = sbr.rel (!%p11_p7) target bundleno = 3 (0x3), region = 71 }

</bundles_post_ra>
